<compile_context>
chip_gen: v7x
topology: tpu7x:2x2x1
jax: 0.10.0
libtpu: 0.0.40
codegen_flags: <defaults>
</compile_context>

<pallas_src>
import math

import jax
import jax.numpy as jnp
from jax.experimental import pallas as pl
from jax.experimental.pallas import tpu as pltpu


def mlp_kernel(xT_ref, w1_ref, b1_ref, w2_ref, o_ref):
    """One batch tile.  xT_ref: (3, TB) with batch on lanes.
    w1_ref: (24, 3)  (PyTorch (out, in) layout)
    b1_ref: (24, 1)
    w2_ref: (24, 1)  (PyTorch (1, 24) weight stored as a column)
    o_ref : (1, TB)  lane-dense output tile
    """
    xT = xT_ref[...]          # (3, TB)
    w1 = w1_ref[...]          # (24, 3)
    b1 = b1_ref[...]          # (24, 1)
    w2 = w2_ref[...]          # (24, 1)
    tb = xT.shape[1]

    # Layer 1: hT = relu(w1 @ xT + b1) as 3 VPU broadcast-MACs over the K=3
    # contraction, accumulator seeded with the bias (no MXU, no extra add).
    hT = jnp.broadcast_to(b1, (24, tb))           # (24, TB), hoisted once
    for k in range(3):                            # unrolled at trace time
        hT = hT + w1[:, k:k + 1] * xT[k:k + 1, :]
    hT = jnp.maximum(hT, 0.0)                     # ReLU on the VPU

    # Layer 2: 24-element dot product = elementwise mul + sublane reduce
    # (one XLU op), then tanh on the EUP.  No second MXU pass.
    y = jnp.sum(hT * w2, axis=0, keepdims=True)   # (1, TB)
    o_ref[...] = jnp.tanh(y).astype(o_ref.dtype)


def deterministic_network(x, w1, b1, w2, *, block_b=1024):
    """x: (B, 3) f32 -> (B, 1) f32, identical semantics to the PyTorch module."""
    B = x.shape[0]

    # Put batch on lanes for the kernel; (B,3)->(3,B) transpose is wrapper-side
    # layout plumbing, not kernel compute.
    xT = x.T                                       # (3, B)

    if B <= block_b:
        # Single grid step, full-array blocks — everything resident in VMEM.
        tb, b_pad = B, B
    else:
        # Batch grid with double-buffered HBM->VMEM pipelining; weights stay
        # resident (constant index_maps).  Per-tile VMEM is tiny (<200 KiB),
        # fits v5e/v6e (128 MiB) and v7x (64 MiB) with huge headroom.
        tb = block_b
        b_pad = pl.cdiv(B, tb) * tb
        xT = jnp.pad(xT, ((0, 0), (0, b_pad - B)))

    yT = pl.pallas_call(
        mlp_kernel,
        out_shape=jax.ShapeDtypeStruct((1, b_pad), x.dtype),
        grid=(b_pad // tb,),
        in_specs=[
            pl.BlockSpec((3, tb), lambda i: (0, i)),    # xT batch tile
            pl.BlockSpec((24, 3), lambda i: (0, 0)),    # w1 (resident)
            pl.BlockSpec((24, 1), lambda i: (0, 0)),    # b1 (resident)
            pl.BlockSpec((24, 1), lambda i: (0, 0)),    # w2 (resident)
        ],
        out_specs=pl.BlockSpec((1, tb), lambda i: (0, i)),  # lane-dense output
        compiler_params=pltpu.CompilerParams(
            dimension_semantics=("parallel",)),         # v7x: shard batch over 2 TCs
    )(xT, w1, b1, w2)

    # Back to PyTorch's (B, 1) layout (strip batch padding if any).
    return yT[:, :B].T


def init_params(key):
    """PyTorch nn.Linear default init (kaiming-uniform weight, uniform bias),
    stored in the layouts the kernel consumes."""
    k1, k2, k3 = jax.random.split(key, 3)
    bound1 = 1.0 / math.sqrt(3.0)       # fan_in = 3
    w1 = jax.random.uniform(k1, (24, 3), jnp.float32, -bound1, bound1)  # (out, in)
    b1 = jax.random.uniform(k2, (24, 1), jnp.float32, -bound1, bound1)
    bound2 = 1.0 / math.sqrt(24.0)      # fan_in = 24
    w2 = jax.random.uniform(k3, (24, 1), jnp.float32, -bound2, bound2)  # (1,24) as column
    return w1, b1, w2


def reference_forward(x, w1, b1, w2):
    h = jnp.maximum(x @ w1.T + b1.T, 0.0)   # (B, 24)
    return jnp.tanh(h @ w2)                 # (B, 1)


if __name__ == "__main__":
    key = jax.random.PRNGKey(0)
    kx, kp = jax.random.split(key)
    w1, b1, w2 = init_params(kp)

    # Small batch: grid of 1, full-array blocks (overhead-bound by design).
    batch = 8
    x = jax.random.normal(kx, (batch, 3), jnp.float32)
    out = jax.block_until_ready(deterministic_network(x, w1, b1, w2))
    ref = reference_forward(x, w1, b1, w2)
    assert out.shape == (batch, 1)
    assert jnp.allclose(out, ref, atol=1e-5, rtol=1e-5)

    # Larger batch: exercises the batch grid + padding + parallel axis path.
    big = 2304
    xb = jax.random.normal(kx, (big, 3), jnp.float32)
    outb = jax.block_until_ready(deterministic_network(xb, w1, b1, w2))
    refb = reference_forward(xb, w1, b1, w2)
    assert outb.shape == (big, 1)
    assert jnp.allclose(outb, refb, atol=1e-5, rtol=1e-5)

    print("KERNEL_OK")
</pallas_src>

<mosaic_0001>
module attributes {stable_mosaic.version = 11 : i64} {
  func.func @mlp_kernel(%arg0: i32, %arg1: memref<3x8xf32, #tpu.memory_space<vmem>>, %arg2: memref<24x3xf32, #tpu.memory_space<vmem>>, %arg3: memref<24x1xf32, #tpu.memory_space<vmem>>, %arg4: memref<24x1xf32, #tpu.memory_space<vmem>>, %arg5: memref<1x8xf32, #tpu.memory_space<vmem>>) attributes {dimension_semantics = [#tpu.dimension_semantics<parallel>], iteration_bounds = array<i64: 1>, scalar_prefetch = 0 : i64, scratch_operands = 0 : i64, tpu.core_type = #tpu.core_type<tc>, window_params = [{transform_indices = @transform_0, window_bounds = array<i64: 3, 8>}, {pipeline_mode = #tpu.pipeline_mode<synchronous>, transform_indices = @transform_1, window_bounds = array<i64: 24, 3>}, {pipeline_mode = #tpu.pipeline_mode<synchronous>, transform_indices = @transform_2, window_bounds = array<i64: 24, 1>}, {pipeline_mode = #tpu.pipeline_mode<synchronous>, transform_indices = @transform_3, window_bounds = array<i64: 24, 1>}, {transform_indices = @transform_4, window_bounds = array<i64: 1, 8>}]} {
    %c0 = arith.constant 0 : index
    %c0_0 = arith.constant 0 : index
    %0 = vector.load %arg1[%c0, %c0_0] : memref<3x8xf32, #tpu.memory_space<vmem>>, vector<3x8xf32>
    %c0_1 = arith.constant 0 : index
    %c0_2 = arith.constant 0 : index
    %1 = vector.load %arg2[%c0_1, %c0_2] : memref<24x3xf32, #tpu.memory_space<vmem>>, vector<24x3xf32>
    %c0_3 = arith.constant 0 : index
    %c0_4 = arith.constant 0 : index
    %2 = vector.load %arg3[%c0_3, %c0_4] : memref<24x1xf32, #tpu.memory_space<vmem>>, vector<24x1xf32>
    %c0_5 = arith.constant 0 : index
    %c0_6 = arith.constant 0 : index
    %3 = vector.load %arg4[%c0_5, %c0_6] : memref<24x1xf32, #tpu.memory_space<vmem>>, vector<24x1xf32>
    %4 = vector.shape_cast %2 : vector<24x1xf32> to vector<24x1xf32>
    %5 = vector.broadcast %4 : vector<24x1xf32> to vector<24x8xf32>
    %6 = vector.extract_strided_slice %1 {offsets = [0, 0], sizes = [24, 1], strides = [1, 1]} : vector<24x3xf32> to vector<24x1xf32>
    %7 = vector.extract_strided_slice %0 {offsets = [0, 0], sizes = [1, 8], strides = [1, 1]} : vector<3x8xf32> to vector<1x8xf32>
    %8 = vector.broadcast %6 : vector<24x1xf32> to vector<24x8xf32>
    %9 = vector.broadcast %7 : vector<1x8xf32> to vector<24x8xf32>
    %10 = arith.mulf %8, %9 : vector<24x8xf32>
    %11 = arith.addf %5, %10 : vector<24x8xf32>
    %12 = vector.extract_strided_slice %1 {offsets = [0, 1], sizes = [24, 1], strides = [1, 1]} : vector<24x3xf32> to vector<24x1xf32>
    %13 = vector.extract_strided_slice %0 {offsets = [1, 0], sizes = [1, 8], strides = [1, 1]} : vector<3x8xf32> to vector<1x8xf32>
    %14 = vector.broadcast %12 : vector<24x1xf32> to vector<24x8xf32>
    %15 = vector.broadcast %13 : vector<1x8xf32> to vector<24x8xf32>
    %16 = arith.mulf %14, %15 : vector<24x8xf32>
    %17 = arith.addf %11, %16 : vector<24x8xf32>
    %18 = vector.extract_strided_slice %1 {offsets = [0, 2], sizes = [24, 1], strides = [1, 1]} : vector<24x3xf32> to vector<24x1xf32>
    %19 = vector.extract_strided_slice %0 {offsets = [2, 0], sizes = [1, 8], strides = [1, 1]} : vector<3x8xf32> to vector<1x8xf32>
    %20 = vector.broadcast %18 : vector<24x1xf32> to vector<24x8xf32>
    %21 = vector.broadcast %19 : vector<1x8xf32> to vector<24x8xf32>
    %22 = arith.mulf %20, %21 : vector<24x8xf32>
    %23 = arith.addf %17, %22 : vector<24x8xf32>
    %cst = arith.constant 0.000000e+00 : f32
    %24 = vector.broadcast %cst : f32 to vector<24x8xf32>
    %25 = arith.maximumf %23, %24 : vector<24x8xf32>
    %26 = vector.broadcast %3 : vector<24x1xf32> to vector<24x8xf32>
    %27 = arith.mulf %25, %26 : vector<24x8xf32>
    %cst_7 = arith.constant dense<0.000000e+00> : vector<8xf32>
    %28 = vector.multi_reduction <add>, %27, %cst_7 [0] : vector<24x8xf32> to vector<8xf32>
    %29 = vector.shape_cast %28 : vector<8xf32> to vector<1x8xf32>
    %30 = math.tanh %29 : vector<1x8xf32>
    %c0_8 = arith.constant 0 : index
    %c0_9 = arith.constant 0 : index
    %31 = vector.load %arg5[%c0_8, %c0_9] : memref<1x8xf32, #tpu.memory_space<vmem>>, vector<1x8xf32>
    tpu.vector_store %arg5[%c0_8, %c0_9], %30 {strides = array<i32>} : memref<1x8xf32, #tpu.memory_space<vmem>>, vector<1x8xf32>,
    return
  }
  func.func @transform_0(%arg0: i32) -> (i32, i32) {
    %c0_i32 = arith.constant 0 : i32
    %c0_i32_0 = arith.constant 0 : i32
    return %c0_i32, %arg0 : i32, i32
  }
  func.func @transform_1(%arg0: i32) -> (i32, i32) {
    %c0_i32 = arith.constant 0 : i32
    %c0_i32_0 = arith.constant 0 : i32
    %c0_i32_1 = arith.constant 0 : i32
    return %c0_i32, %c0_i32_0 : i32, i32
  }
  func.func @transform_2(%arg0: i32) -> (i32, i32) {
    %c0_i32 = arith.constant 0 : i32
    %c0_i32_0 = arith.constant 0 : i32
    %c0_i32_1 = arith.constant 0 : i32
    return %c0_i32, %c0_i32_0 : i32, i32
  }
  func.func @transform_3(%arg0: i32) -> (i32, i32) {
    %c0_i32 = arith.constant 0 : i32
    %c0_i32_0 = arith.constant 0 : i32
    %c0_i32_1 = arith.constant 0 : i32
    return %c0_i32, %c0_i32_0 : i32, i32
  }
  func.func @transform_4(%arg0: i32) -> (i32, i32) {
    %c0_i32 = arith.constant 0 : i32
    %c0_i32_0 = arith.constant 0 : i32
    return %c0_i32, %arg0 : i32, i32
  }
}

</mosaic_0001>

<bundles_post_ra>
// kernel: tpu_custom_call.1
= control target key start
LH: loop header
LB: loop body
LE: loop exit
PB: predicated region body
PF: predicated region fallthrough
CT: control target
= control target key end

     0   :  { %v202_v2 = vmov 0   ;;  %s273_s0 = inlined_call_operand.vmem [shape: f32[3,8], index: 0, kind: input, shape index: {}]   ;;  %s274_s1 = inlined_call_operand.vmem [shape: f32[24,3], index: 1, kind: input, shape index: {}]   ;;  %s275_s2 = inlined_call_operand.vmem [shape: f32[24,1], index: 2, kind: input, shape index: {}]   ;;  %s276_s3 = inlined_call_operand.vmem [shape: f32[24,1], index: 3, kind: input, shape index: {}]   ;;  %s277_s4 = inlined_call_operand.hbm [shape: f32[1,8], index: 4, kind: output, shape index: {}]  }
   0x1   :  { %v22_v0 = vld [vmem:[%s275_s2] sm:$0xff]  ;;  %167 = vset.pattern.permute.xlu1 %v202_v2  ;;  %166 = vset.pattern.permute.xlu0 %v202_v2  ;;  %v23_v3 = vld [vmem:[%s275_s2 + $0x8] sm:$0xff] }
   0x2   :  { %v19_v1 = vld [vmem:[%s274_s1] sm:$0xff]  ;;  %30 = vperm.xlu1 %167, %v22_v0   ;;  %v20_v4 = vld [vmem:[%s274_s1 + $0x8] sm:$0xff] }
   0x3   :  { %45 = vperm.xlu0 %166, %v19_v1  }
   0x4   :  { %9 = vsyncpa [#allocation3], 0  ;;  %v21_v5 = vld [vmem:[%s274_s1 + $0x10] sm:$0xff]  ;;  %v203_v6 = vmov 1   ;;  %v204_v8 = vmov 2   ;;  %v25_v9 = vld [vmem:[%s276_s3] sm:$0xff]  ;;  %v58_v14 = vlaneseq }
   0x5   :  { %v24_v7 = vld [vmem:[%s275_s2 + $0x10] sm:$0xff]  ;;  %v26_v10 = vld [vmem:[%s276_s3 + $0x8] sm:$0xff]  ;;  %v18_v21 = vld [vmem:[%s273_s0] sm:$0x7]  ;;  %vm133_vm0 = vcmask 64512   ;;  %s205_s0 = smov [#allocation2]  }
   0x6   :  { %35 = vperm.xlu1 %167, %v23_v3   ;;  %v27_v11 = vld [vmem:[%s276_s3 + $0x10] sm:$0xff]  ;;  %v59_v17 = vshrl.u32 %v58_v14, 7  ;;  %s154_s3 = sshll.u32 %s205_s0, 4  ;;  %vm146_vm1 = vcmask 57344   ;;  %s155_s3 = int_to_ptr.vmem [resolvable:$true] %s154_s3 }
   0x7   :  { %50 = vperm.xlu0 %166, %v20_v4   ;;  %s178_s7 = scalar_lea.vmem %s155_s3, 16  ;;  %s182_s8 = scalar_lea.vmem %s155_s3, 32 }
   0x8   :  { %v60_v20 = vsub.s32 0, %v59_v17  ;;  %v82_v22 = vsub.s32 1, %v59_v17  ;;  %v104_v26 = vsub.s32 2, %v59_v17  ;;  %p179_p0 = scmp.ne.s32.totalorder %s155_s3, %s178_s7  ;;  %p183_p1 = scmp.lt.s32.totalorder %s155_s3, %s155_s3 }
   0x9   :  { %p184_p2 = scmp.lt.s32.totalorder %s182_s8, %s178_s7 }
   0xa   :  { %168 = vset.pattern.permute.xlu1 %v203_v6  ;;  %v61_v24 = vrot.slane %v18_v21, %v60_v20  ;;  %v83_v27 = vrot.slane %v18_v21, %v82_v22  ;;  %v105_v29 = vrot.slane %v18_v21, %v104_v26 }
   0xb   :  { %55 = vperm.xlu0 %166, %v21_v5   ;;  %69 = vperm.xlu1 %168, %v19_v1   ;;  %p185_p3 = por %p184_p2, %p183_p1 }
   0xd   :  { %p186_p4 = pnand %p185_p3, %p179_p0 }
   0xf   :  { %169 = vset.pattern.permute.xlu0 %v203_v6  ;;  %170 = vset.pattern.permute.xlu1 %v202_v2 }
  0x10   :  { %73 = vperm.xlu0 %169, %v20_v4   ;;  %40 = vperm.xlu1 %170, %v24_v7  }
  0x14   :  { %172 = vset.pattern.permute.xlu0 %v204_v8  ;;  %171 = vset.pattern.permute.xlu1 %v203_v6 }
  0x15   :  { %91 = vperm.xlu0 %172, %v19_v1   ;;  %77 = vperm.xlu1 %171, %v21_v5  }
  0x19   :  { %174 = vset.pattern.permute.xlu0 %v202_v2  ;;  %173 = vset.pattern.permute.xlu1 %v204_v8 }
  0x1a   :  { %117 = vperm.xlu0 %174, %v25_v9   ;;  %95 = vperm.xlu1 %173, %v20_v4  }
  0x1e   :  { %99 = vperm.xlu1 %173, %v21_v5  }
  0x22   :  { %175 = vset.pattern.permute.xlu1 %v202_v2 }
  0x23   :  { %122 = vperm.xlu1 %175, %v26_v10  }
  0x27   :  { %127 = vperm.xlu1 %175, %v27_v11  }
  0x81   :  { %v31_v12 = vpop.permute.xlu1 %30 }
  0x82   :  { %v46_v13 = vpop.permute.xlu0 %45 }
  0x83   :  { %v62_v28 = vmul.f32 %v61_v24, %v46_v13 }
  0x85   :  { %v36_v15 = vpop.permute.xlu1 %35  ;;  %v65_v34 = vadd.f32 %v62_v28, %v31_v12 }
  0x86   :  { %v51_v16 = vpop.permute.xlu0 %50 }
  0x87   :  { %v63_v32 = vmul.f32 %v61_v24, %v51_v16 }
  0x89   :  { %v66_v37 = vadd.f32 %v63_v32, %v36_v15 }
  0x8a   :  { %v56_v18 = vpop.permute.xlu0 %55  ;;  %v70_v19 = vpop.permute.xlu1 %69 }
  0x8b   :  { %v84_v33 = vmul.f32 %v83_v27, %v70_v19  ;;  %v64_v39 = vmul.f32 %v61_v24, %v56_v18 }
  0x8d   :  { %v87_v38 = vadd.f32 %v84_v33, %v65_v34 }
  0x8f   :  { %v74_v23 = vpop.permute.xlu0 %73  ;;  %v41_v25 = vpop.permute.xlu1 %40 }
  0x90   :  { %v85_v35 = vmul.f32 %v83_v27, %v74_v23  ;;  %v67_v45 = vadd.f32 %v64_v39, %v41_v25 }
  0x92   :  { %v88_v42 = vadd.f32 %v85_v35, %v66_v37 }
  0x94   :  { %v92_v30 = vpop.permute.xlu0 %91  ;;  %v78_v31 = vpop.permute.xlu1 %77 }
  0x95   :  { %v106_v36 = vmul.f32 %v105_v29, %v92_v30  ;;  %v86_v44 = vmul.f32 %v83_v27, %v78_v31 }
  0x97   :  { %v109_v43 = vadd.f32 %v106_v36, %v87_v38  ;;  %v89_v49 = vadd.f32 %v86_v44, %v67_v45 }
  0x99   :  { %v96_v40 = vpop.permute.xlu1 %95  ;;  %v112_v50 = vmax.f32 %v109_v43, 0.0  ;;  %v118_v51 = vpop.permute.xlu0 %117 }
  0x9a   :  { %v107_v41 = vmul.f32 %v105_v29, %v96_v40 }
  0x9b   :  { %v130_v55 = vmul.f32 %v118_v51, %v112_v50 }
  0x9c   :  { %v110_v46 = vadd.f32 %v107_v41, %v88_v42 }
  0x9d   :  { %v100_v47 = vpop.permute.xlu1 %99  ;;  %v134_v60 = vsel %vm133_vm0, %v130_v55, 0.0 }
  0x9e   :  { %v108_v48 = vmul.f32 %v105_v29, %v100_v47  ;;  %v113_v53 = vmax.f32 %v110_v46, 0.0 }
  0xa0   :  { %v111_v52 = vadd.f32 %v108_v48, %v89_v49 }
  0xa2   :  { %v123_v54 = vpop.permute.xlu1 %122  ;;  %v114_v58 = vmax.f32 %v111_v52, 0.0 }
  0xa3   :  { %v131_v56 = vmul.f32 %v123_v54, %v113_v53 }
  0xa5   :  { %v135_v57 = vsel %vm133_vm0, %v131_v56, 0.0 }
  0xa6   :  { %v128_v59 = vpop.permute.xlu1 %127  ;;  %v136_v62 = vadd.f32 %v135_v57, %v134_v60 }
  0xa7   :  { %v132_v61 = vmul.f32 %v128_v59, %v114_v58 }
  0xa9   :  { %v137_v63 = vsel %vm133_vm0, %v132_v61, 0.0 }
  0xaa   :  { %v138_v0 = vadd.f32 %v137_v63, %v136_v62 }
  0xac   :  { %v139_v1 = vrot.slane %v138_v0, 4 }
  0xae   :  { %v140_v2 = vadd.f32 %v139_v1, %v138_v0 }
  0xb0   :  { %v141_v3 = vrot.slane %v140_v2, 2 }
  0xb2   :  { %v142_v4 = vadd.f32 %v141_v3, %v140_v2 }
  0xb4   :  { %v143_v5 = vrot.slane %v142_v4, 1 }
  0xb6   :  { %v144_v6 = vadd.f32 %v143_v5, %v142_v4 }
  0xb8   :  { %176 = vtanh.f32 %v144_v6 }
  0xc2   :  { %v177_v7 = vpop.eup %176 }
  0xc3   :  { %147 = vst.msk [vmem:[#allocation2] sm:$0x1] %vm146_vm1, %v177_v7 }
  0xc4   :  { %189 = shalt.err (!%p186_p4)
}
  0xc5   :  { %s190_s11 = scalar_lea.hbm %s277_s4, 16 }
  0xc6   :  { %p191_p5 = scmp.ne.s32.totalorder %s277_s4, %s190_s11  ;;  %p194_p6 = scmp.lt.u32.totalorder %s190_s11, %s277_s4 }
  0xc8   :  { %p196_p7 = pnand %p194_p6, %p191_p5 }
  0xca   :  { %199 = shalt.err (!%p196_p7)
}
  0xcb   :  { %157 = dma.vmem_to_hbm [thread:$0]  %s155_s3, 16, %s277_s4, [#allocation3]  }
  0xcc   :  { %200 = dma.done.wait [#allocation3], 16  }
  0xcd   :  { %201 = vsyncadd [#allocation3], 4294967280 }
  0xce   :  { %161 = vsyncpa [#allocation3], 1 }

</bundles_post_ra>
